<compile_context>
chip_gen: v7x
topology: tpu7x:2x2x1
jax: 0.10.0
libtpu: 0.0.40
codegen_flags: <defaults>
</compile_context>

<pallas_src>
import functools
import re

import jax
import jax.numpy as jnp
from jax.experimental import pallas as pl
from jax.experimental.pallas import tpu as pltpu


def _tpu_generation():
    """Best-effort TPU generation (5/6/7/...); defaults to 6 if unknown."""
    try:
        kind = jax.devices()[0].device_kind.lower()
    except Exception:
        return 6
    m = re.search(r"v(\d+)", kind)
    return int(m.group(1)) if m else 6


def _pick_chunk(hw, max_chunk=1024):
    """Lane-chunk for the HW reduction: a 128-multiple divisor of HW, or HW itself."""
    if hw <= max_chunk:
        return hw
    for c in range(max_chunk - (max_chunk % 128), 127, -128):
        if hw % c == 0:
            return c
    return hw


def _pick_tb(batch, per_sample_bytes, gen, requested=None):
    """Batch-tile size: big enough to amortize per-step overhead, generation-aware."""
    if requested is not None:
        return max(1, min(int(requested), batch))
    # Per-input block target: larger on 128 MiB-VMEM chips, smaller on v7x (64 MiB).
    target = (3 << 20) if gen >= 7 else (7 << 20)
    tb = int(max(1, target // max(1, per_sample_bytes)))
    if gen >= 7 and batch >= 2:
        tb = min(tb, (batch + 1) // 2)   # >=2 grid steps so both TensorCores get work
    if tb >= batch:
        return batch
    if tb >= 8:
        tb = (tb // 8) * 8
    return max(1, tb)


def _ohkm_kernel(*refs, use_target_weight, topk, chunk, bf16_native_sub):
    if use_target_weight:
        pred_ref, gt_ref, tw_ref, out_ref = refs
    else:
        pred_ref, gt_ref, out_ref = refs
        tw_ref = None

    tb, nj, hw = pred_ref.shape
    n_chunks = max(1, hw // chunk)

    # Streaming sum of squared differences over the heatmap axis, processed in
    # lane-chunks so only a (TB, J, chunk) f32 working set is live at a time.
    ssq = jnp.zeros((tb, nj), jnp.float32)
    for c in range(n_chunks):
        c0 = c * chunk
        p = pred_ref[:, :, c0:c0 + chunk]
        g = gt_ref[:, :, c0:c0 + chunk]
        if bf16_native_sub:
            d = (p - g).astype(jnp.float32)       # bf16 sub (packed) + one widening cast
        else:
            d = p.astype(jnp.float32) - g.astype(jnp.float32)
        ssq = ssq + jnp.sum(d * d, axis=-1)

    # mean((w*p - w*g)^2) == w^2 * sum((p-g)^2) / HW
    scale = 0.5 / float(hw)
    if use_target_weight:
        w = tw_ref[0].astype(jnp.float32)          # (TB, J)
        per_joint = ssq * (w * w) * scale
    else:
        per_joint = ssq * scale

    # OHKM top-k, vectorized over the TB samples (J lives on the lane axis).
    iota = jax.lax.broadcasted_iota(jnp.int32, (tb, nj), 1)
    s = jnp.zeros((tb, 1), jnp.float32)
    nbits = max(1, (nj - 1).bit_length())
    if nbits <= 8:
        # per_joint >= 0, so its f32 bit pattern is order-preserving as int32.
        # Embed the joint index in the low bits -> unique keys -> one cross-lane
        # max per iteration (instead of max + argmin), halving the XLU tail.
        clear = jnp.int32(~((1 << nbits) - 1))
        keys = (pltpu.bitcast(per_joint, jnp.int32) & clear) | ((nj - 1) - iota)
        for _ in range(topk):
            mk = jnp.max(keys, axis=-1, keepdims=True)            # (TB, 1)
            s = s + pltpu.bitcast(mk & clear, jnp.float32)
            keys = jnp.where(keys == mk, jnp.int32(-1), keys)     # drop selected lane
    else:
        # Fallback for very large J: exact iterative max + drop-first-occurrence.
        cur = per_joint
        for _ in range(topk):
            m = jnp.max(cur, axis=-1, keepdims=True)
            fi = jnp.min(jnp.where(cur == m, iota, nj), axis=-1, keepdims=True)
            cur = jnp.where(iota == fi, -jnp.inf, cur)
            s = s + m

    # Raw per-sample top-k sums; the 1/(topk * B) scaling happens in the wrapper.
    out_ref[0] = s


def joints_ohkm_mse_loss(output, target, target_weight=None,
                         use_target_weight=True, topk=8, block_b=None):
    B, J, H, W = output.shape
    HW = H * W
    if topk > J:
        raise ValueError(f"topk={topk} must be <= num_joints={J}")

    pred = output.reshape(B, J, HW)               # native dtype; no f32 upcast here
    gt = target.reshape(B, J, HW)

    gen = _tpu_generation()
    itemsize = jnp.dtype(pred.dtype).itemsize
    CH = _pick_chunk(HW)
    TB = _pick_tb(B, J * HW * itemsize, gen, requested=block_b)

    # VMEM budget: 2 inputs x 2 pipeline buffers (native dtype) + f32 chunk
    # working set, kept inside a generation-aware cap (v7x has 64 MiB/TC).
    cap = (48 << 20) if gen >= 7 else (100 << 20)

    def vmem_need(tb):
        j_pad = -(-J // 8) * 8
        hw_pad = -(-HW // 128) * 128
        ch_pad = -(-CH // 128) * 128
        return (4 * tb * j_pad * hw_pad * itemsize     # double-buffered inputs
                + 4 * tb * j_pad * ch_pad * 4          # f32 chunk temporaries
                + (3 << 20))                           # tw/out/compiler slack

    while TB > 1 and vmem_need(TB) > cap:
        TB = max(1, TB // 2)

    NT = pl.cdiv(B, TB)
    Bp = NT * TB

    tw = target_weight.reshape(B, J) if use_target_weight else None

    if Bp != B:
        # Zero padding contributes exactly 0 to the top-k sums.
        pred = jnp.pad(pred, ((0, Bp - B), (0, 0), (0, 0)))
        gt = jnp.pad(gt, ((0, Bp - B), (0, 0), (0, 0)))
        if use_target_weight:
            tw = jnp.pad(tw, ((0, Bp - B), (0, 0)))

    bf16_native_sub = bool(gen >= 6
                           and pred.dtype == jnp.bfloat16
                           and gt.dtype == jnp.bfloat16)

    kernel = functools.partial(
        _ohkm_kernel, use_target_weight=use_target_weight, topk=int(topk),
        chunk=CH, bf16_native_sub=bf16_native_sub)

    in_specs = [
        pl.BlockSpec((TB, J, HW), lambda b: (b, 0, 0)),
        pl.BlockSpec((TB, J, HW), lambda b: (b, 0, 0)),
    ]
    args = [pred, gt]
    if use_target_weight:
        in_specs.append(pl.BlockSpec((1, TB, J), lambda b: (b, 0, 0)))
        args.append(tw.reshape(NT, TB, J))

    # Advisory cost estimate: pure streaming reduction.
    bytes_accessed = 2 * Bp * J * HW * itemsize + Bp * 4
    if use_target_weight:
        bytes_accessed += Bp * J * jnp.dtype(tw.dtype).itemsize
    cost = pl.CostEstimate(
        flops=int(3 * Bp * J * HW + 4 * Bp * J + 6 * Bp * topk),
        transcendentals=0,
        bytes_accessed=int(bytes_accessed))

    vmem_limit = int(min(cap, max(32 << 20, vmem_need(TB))))

    out = pl.pallas_call(
        kernel,
        out_shape=jax.ShapeDtypeStruct((NT, TB, 1), jnp.float32),
        grid=(NT,),
        in_specs=in_specs,
        out_specs=pl.BlockSpec((1, TB, 1), lambda b: (b, 0, 0)),
        compiler_params=pltpu.CompilerParams(
            dimension_semantics=("parallel",),
            vmem_limit_bytes=vmem_limit),
        cost_estimate=cost,
    )(*args)

    per_sample = out.reshape(Bp)[:B]               # raw top-k sums per real sample
    return jnp.sum(per_sample) / jnp.float32(topk * B)


def _reference(output, target, target_weight=None, use_target_weight=True, topk=8):
    # Plain-JAX reference mirroring the PyTorch forward.
    B, J = output.shape[0], output.shape[1]
    pred = output.reshape(B, J, -1).astype(jnp.float32)
    gt = target.reshape(B, J, -1).astype(jnp.float32)
    if use_target_weight:
        w = target_weight.reshape(B, J, 1).astype(jnp.float32)
        pred = pred * w
        gt = gt * w
    loss = 0.5 * jnp.mean((pred - gt) ** 2, axis=2)          # (B, J)
    topv, _ = jax.lax.top_k(loss, topk)
    return jnp.mean(jnp.sum(topv, axis=1) / topk)


if __name__ == "__main__":
    key = jax.random.PRNGKey(0)

    def check(B, J, H, W, dtype, use_tw, topk, block_b=None, seed=0, rtol=1e-4):
        k1, k2, k3 = jax.random.split(jax.random.fold_in(key, seed), 3)
        output = jax.random.normal(k1, (B, J, H, W), dtype=jnp.float32).astype(dtype)
        target = jax.random.normal(k2, (B, J, H, W), dtype=jnp.float32).astype(dtype)
        tw = jax.random.uniform(k3, (B, J, 1), dtype=jnp.float32) if use_tw else None
        res = joints_ohkm_mse_loss(output, target, tw, use_target_weight=use_tw,
                                   topk=topk, block_b=block_b)
        res = jax.block_until_ready(res)
        ref = _reference(output, target, tw, use_target_weight=use_tw, topk=topk)
        err = abs(float(res) - float(ref))
        assert err <= rtol * max(1.0, abs(float(ref))), (
            B, J, H, W, str(dtype), float(res), float(ref), err)

    # Main config (num_joints=16 so topk=8 is valid), f32 heatmaps.
    check(2, 16, 16, 16, jnp.float32, True, 8, seed=0)
    # bf16 heatmaps streamed natively; subtracted in bf16 on bf16-capable VPUs.
    check(4, 16, 16, 16, jnp.bfloat16, True, 8, seed=1, rtol=5e-4)
    # No target weight + multi-tile parallel grid with batch padding (B=10, TB=8).
    check(10, 16, 8, 8, jnp.float32, False, 8, block_b=8, seed=2)

    print("KERNEL_OK")
</pallas_src>

<mosaic_0001>
module attributes {stable_mosaic.version = 11 : i64} {
  func.func @_ohkm_kernel(%arg0: i32, %arg1: memref<2x16x256xf32, #tpu.memory_space<vmem>>, %arg2: memref<2x16x256xf32, #tpu.memory_space<vmem>>, %arg3: memref<1x2x16xf32, #tpu.memory_space<vmem>>, %arg4: memref<1x2x1xf32, #tpu.memory_space<vmem>>) attributes {dimension_semantics = [#tpu.dimension_semantics<parallel>], iteration_bounds = array<i64: 1>, scalar_prefetch = 0 : i64, scratch_operands = 0 : i64, tpu.core_type = #tpu.core_type<tc>, window_params = [{transform_indices = @transform_0, window_bounds = array<i64: 2, 16, 256>}, {transform_indices = @transform_1, window_bounds = array<i64: 2, 16, 256>}, {transform_indices = @transform_2, window_bounds = array<i64: 1, 2, 16>}, {transform_indices = @transform_3, window_bounds = array<i64: 1, 2, 1>}]} {
    %cst = arith.constant 0.000000e+00 : f32
    %0 = vector.broadcast %cst : f32 to vector<2x16xf32>
    %c0 = arith.constant 0 : index
    %c0_0 = arith.constant 0 : index
    %c0_1 = arith.constant 0 : index
    %1 = vector.load %arg1[%c0, %c0_0, %c0_1] : memref<2x16x256xf32, #tpu.memory_space<vmem>>, vector<2x16x256xf32>
    %c0_2 = arith.constant 0 : index
    %c0_3 = arith.constant 0 : index
    %c0_4 = arith.constant 0 : index
    %2 = vector.load %arg2[%c0_2, %c0_3, %c0_4] : memref<2x16x256xf32, #tpu.memory_space<vmem>>, vector<2x16x256xf32>
    %3 = arith.subf %1, %2 : vector<2x16x256xf32>
    %4 = arith.mulf %3, %3 : vector<2x16x256xf32>
    %cst_5 = arith.constant dense<0.000000e+00> : vector<2x16xf32>
    %5 = vector.multi_reduction <add>, %4, %cst_5 [2] : vector<2x16x256xf32> to vector<2x16xf32>
    %6 = arith.addf %0, %5 : vector<2x16xf32>
    %c0_6 = arith.constant 0 : index
    %c0_7 = arith.constant 0 : index
    %c0_8 = arith.constant 0 : index
    %7 = vector.load %arg3[%c0_6, %c0_7, %c0_8] : memref<1x2x16xf32, #tpu.memory_space<vmem>>, vector<1x2x16xf32>
    %8 = vector.shape_cast %7 : vector<1x2x16xf32> to vector<2x16xf32>
    %9 = arith.mulf %8, %8 : vector<2x16xf32>
    %10 = arith.mulf %6, %9 : vector<2x16xf32>
    %cst_9 = arith.constant 0.001953125 : f32
    %11 = vector.broadcast %cst_9 : f32 to vector<2x16xf32>
    %12 = arith.mulf %10, %11 : vector<2x16xf32>
    %13 = tpu.iota {dimensions = array<i32: 1>} : vector<2x16xi32>
    %cst_10 = arith.constant 0.000000e+00 : f32
    %14 = vector.broadcast %cst_10 : f32 to vector<2x1xf32>
    %15 = tpu.bitcast %12 : vector<2x16xf32> -> vector<2x16xi32>
    %c-16_i32 = arith.constant -16 : i32
    %16 = vector.broadcast %c-16_i32 : i32 to vector<2x16xi32>
    %17 = arith.andi %15, %16 : vector<2x16xi32>
    %c15_i32 = arith.constant 15 : i32
    %18 = vector.broadcast %c15_i32 : i32 to vector<2x16xi32>
    %19 = arith.subi %18, %13 : vector<2x16xi32>
    %20 = arith.ori %17, %19 : vector<2x16xi32>
    %cst_11 = arith.constant dense<-2147483648> : vector<2xi32>
    %21 = vector.multi_reduction <maxsi>, %20, %cst_11 [1] : vector<2x16xi32> to vector<2xi32>
    %22 = vector.shape_cast %21 : vector<2xi32> to vector<2x1xi32>
    %c-16_i32_12 = arith.constant -16 : i32
    %23 = vector.broadcast %c-16_i32_12 : i32 to vector<2x1xi32>
    %24 = arith.andi %22, %23 : vector<2x1xi32>
    %25 = tpu.bitcast %24 : vector<2x1xi32> -> vector<2x1xf32>
    %26 = arith.addf %14, %25 : vector<2x1xf32>
    %27 = vector.broadcast %22 : vector<2x1xi32> to vector<2x16xi32>
    %28 = arith.cmpi eq, %20, %27 : vector<2x16xi32>
    %c-1_i32 = arith.constant -1 : i32
    %29 = vector.broadcast %c-1_i32 : i32 to vector<2x16xi32>
    %30 = arith.select %28, %29, %20 : vector<2x16xi1>, vector<2x16xi32>
    %cst_13 = arith.constant dense<-2147483648> : vector<2xi32>
    %31 = vector.multi_reduction <maxsi>, %30, %cst_13 [1] : vector<2x16xi32> to vector<2xi32>
    %32 = vector.shape_cast %31 : vector<2xi32> to vector<2x1xi32>
    %c-16_i32_14 = arith.constant -16 : i32
    %33 = vector.broadcast %c-16_i32_14 : i32 to vector<2x1xi32>
    %34 = arith.andi %32, %33 : vector<2x1xi32>
    %35 = tpu.bitcast %34 : vector<2x1xi32> -> vector<2x1xf32>
    %36 = arith.addf %26, %35 : vector<2x1xf32>
    %37 = vector.broadcast %32 : vector<2x1xi32> to vector<2x16xi32>
    %38 = arith.cmpi eq, %30, %37 : vector<2x16xi32>
    %c-1_i32_15 = arith.constant -1 : i32
    %39 = vector.broadcast %c-1_i32_15 : i32 to vector<2x16xi32>
    %40 = arith.select %38, %39, %30 : vector<2x16xi1>, vector<2x16xi32>
    %cst_16 = arith.constant dense<-2147483648> : vector<2xi32>
    %41 = vector.multi_reduction <maxsi>, %40, %cst_16 [1] : vector<2x16xi32> to vector<2xi32>
    %42 = vector.shape_cast %41 : vector<2xi32> to vector<2x1xi32>
    %c-16_i32_17 = arith.constant -16 : i32
    %43 = vector.broadcast %c-16_i32_17 : i32 to vector<2x1xi32>
    %44 = arith.andi %42, %43 : vector<2x1xi32>
    %45 = tpu.bitcast %44 : vector<2x1xi32> -> vector<2x1xf32>
    %46 = arith.addf %36, %45 : vector<2x1xf32>
    %47 = vector.broadcast %42 : vector<2x1xi32> to vector<2x16xi32>
    %48 = arith.cmpi eq, %40, %47 : vector<2x16xi32>
    %c-1_i32_18 = arith.constant -1 : i32
    %49 = vector.broadcast %c-1_i32_18 : i32 to vector<2x16xi32>
    %50 = arith.select %48, %49, %40 : vector<2x16xi1>, vector<2x16xi32>
    %cst_19 = arith.constant dense<-2147483648> : vector<2xi32>
    %51 = vector.multi_reduction <maxsi>, %50, %cst_19 [1] : vector<2x16xi32> to vector<2xi32>
    %52 = vector.shape_cast %51 : vector<2xi32> to vector<2x1xi32>
    %c-16_i32_20 = arith.constant -16 : i32
    %53 = vector.broadcast %c-16_i32_20 : i32 to vector<2x1xi32>
    %54 = arith.andi %52, %53 : vector<2x1xi32>
    %55 = tpu.bitcast %54 : vector<2x1xi32> -> vector<2x1xf32>
    %56 = arith.addf %46, %55 : vector<2x1xf32>
    %57 = vector.broadcast %52 : vector<2x1xi32> to vector<2x16xi32>
    %58 = arith.cmpi eq, %50, %57 : vector<2x16xi32>
    %c-1_i32_21 = arith.constant -1 : i32
    %59 = vector.broadcast %c-1_i32_21 : i32 to vector<2x16xi32>
    %60 = arith.select %58, %59, %50 : vector<2x16xi1>, vector<2x16xi32>
    %cst_22 = arith.constant dense<-2147483648> : vector<2xi32>
    %61 = vector.multi_reduction <maxsi>, %60, %cst_22 [1] : vector<2x16xi32> to vector<2xi32>
    %62 = vector.shape_cast %61 : vector<2xi32> to vector<2x1xi32>
    %c-16_i32_23 = arith.constant -16 : i32
    %63 = vector.broadcast %c-16_i32_23 : i32 to vector<2x1xi32>
    %64 = arith.andi %62, %63 : vector<2x1xi32>
    %65 = tpu.bitcast %64 : vector<2x1xi32> -> vector<2x1xf32>
    %66 = arith.addf %56, %65 : vector<2x1xf32>
    %67 = vector.broadcast %62 : vector<2x1xi32> to vector<2x16xi32>
    %68 = arith.cmpi eq, %60, %67 : vector<2x16xi32>
    %c-1_i32_24 = arith.constant -1 : i32
    %69 = vector.broadcast %c-1_i32_24 : i32 to vector<2x16xi32>
    %70 = arith.select %68, %69, %60 : vector<2x16xi1>, vector<2x16xi32>
    %cst_25 = arith.constant dense<-2147483648> : vector<2xi32>
    %71 = vector.multi_reduction <maxsi>, %70, %cst_25 [1] : vector<2x16xi32> to vector<2xi32>
    %72 = vector.shape_cast %71 : vector<2xi32> to vector<2x1xi32>
    %c-16_i32_26 = arith.constant -16 : i32
    %73 = vector.broadcast %c-16_i32_26 : i32 to vector<2x1xi32>
    %74 = arith.andi %72, %73 : vector<2x1xi32>
    %75 = tpu.bitcast %74 : vector<2x1xi32> -> vector<2x1xf32>
    %76 = arith.addf %66, %75 : vector<2x1xf32>
    %77 = vector.broadcast %72 : vector<2x1xi32> to vector<2x16xi32>
    %78 = arith.cmpi eq, %70, %77 : vector<2x16xi32>
    %c-1_i32_27 = arith.constant -1 : i32
    %79 = vector.broadcast %c-1_i32_27 : i32 to vector<2x16xi32>
    %80 = arith.select %78, %79, %70 : vector<2x16xi1>, vector<2x16xi32>
    %cst_28 = arith.constant dense<-2147483648> : vector<2xi32>
    %81 = vector.multi_reduction <maxsi>, %80, %cst_28 [1] : vector<2x16xi32> to vector<2xi32>
    %82 = vector.shape_cast %81 : vector<2xi32> to vector<2x1xi32>
    %c-16_i32_29 = arith.constant -16 : i32
    %83 = vector.broadcast %c-16_i32_29 : i32 to vector<2x1xi32>
    %84 = arith.andi %82, %83 : vector<2x1xi32>
    %85 = tpu.bitcast %84 : vector<2x1xi32> -> vector<2x1xf32>
    %86 = arith.addf %76, %85 : vector<2x1xf32>
    %87 = vector.broadcast %82 : vector<2x1xi32> to vector<2x16xi32>
    %88 = arith.cmpi eq, %80, %87 : vector<2x16xi32>
    %c-1_i32_30 = arith.constant -1 : i32
    %89 = vector.broadcast %c-1_i32_30 : i32 to vector<2x16xi32>
    %90 = arith.select %88, %89, %80 : vector<2x16xi1>, vector<2x16xi32>
    %cst_31 = arith.constant dense<-2147483648> : vector<2xi32>
    %91 = vector.multi_reduction <maxsi>, %90, %cst_31 [1] : vector<2x16xi32> to vector<2xi32>
    %92 = vector.shape_cast %91 : vector<2xi32> to vector<2x1xi32>
    %c-16_i32_32 = arith.constant -16 : i32
    %93 = vector.broadcast %c-16_i32_32 : i32 to vector<2x1xi32>
    %94 = arith.andi %92, %93 : vector<2x1xi32>
    %95 = tpu.bitcast %94 : vector<2x1xi32> -> vector<2x1xf32>
    %96 = arith.addf %86, %95 : vector<2x1xf32>
    %c0_33 = arith.constant 0 : index
    %c0_34 = arith.constant 0 : index
    %c0_35 = arith.constant 0 : index
    %97 = vector.load %arg4[%c0_33, %c0_34, %c0_35] : memref<1x2x1xf32, #tpu.memory_space<vmem>>, vector<1x2x1xf32>
    %98 = vector.shape_cast %97 : vector<1x2x1xf32> to vector<2x1xf32>
    %99 = vector.shape_cast %96 : vector<2x1xf32> to vector<1x2x1xf32>
    tpu.vector_store %arg4[%c0_33, %c0_34, %c0_35], %99 {strides = array<i32>} : memref<1x2x1xf32, #tpu.memory_space<vmem>>, vector<1x2x1xf32>,
    return
  }
  func.func @transform_0(%arg0: i32) -> (i32, i32, i32) {
    %c0_i32 = arith.constant 0 : i32
    %c0_i32_0 = arith.constant 0 : i32
    %c0_i32_1 = arith.constant 0 : i32
    return %arg0, %c0_i32, %c0_i32_0 : i32, i32, i32
  }
  func.func @transform_1(%arg0: i32) -> (i32, i32, i32) {
    %c0_i32 = arith.constant 0 : i32
    %c0_i32_0 = arith.constant 0 : i32
    %c0_i32_1 = arith.constant 0 : i32
    return %arg0, %c0_i32, %c0_i32_0 : i32, i32, i32
  }
  func.func @transform_2(%arg0: i32) -> (i32, i32, i32) {
    %c0_i32 = arith.constant 0 : i32
    %c0_i32_0 = arith.constant 0 : i32
    %c0_i32_1 = arith.constant 0 : i32
    return %arg0, %c0_i32, %c0_i32_0 : i32, i32, i32
  }
  func.func @transform_3(%arg0: i32) -> (i32, i32, i32) {
    %c0_i32 = arith.constant 0 : i32
    %c0_i32_0 = arith.constant 0 : i32
    %c0_i32_1 = arith.constant 0 : i32
    return %arg0, %c0_i32, %c0_i32_0 : i32, i32, i32
  }
}

</mosaic_0001>

<bundles_post_ra>
// kernel: tpu_custom_call.1
= control target key start
LH: loop header
LB: loop body
LE: loop exit
PB: predicated region body
PF: predicated region fallthrough
CT: control target
= control target key end

     0   :  { %8 = vsyncpa [#allocation3], 0  ;;  %s863_s0 = inlined_call_operand.hbm [shape: f32[2,16,256], index: 0, kind: input, shape index: {}]   ;;  %s864_s1 = inlined_call_operand.hbm [shape: f32[2,16,256], index: 1, kind: input, shape index: {}]   ;;  %s865_s2 = inlined_call_operand.vmem [shape: f32[1,2,16], index: 2, kind: input, shape index: {}]   ;;  %s866_s3 = inlined_call_operand.vmem [shape: f32[1,2,1], index: 3, kind: output, shape index: {}]  }
   0x1   :  { %9 = vsyncpa [#allocation5], 0  ;;  %s720_s12 = smov [#allocation2]   ;;  %s672_s16 = scalar_lea.hbm %s863_s0, 1024 }
   0x2   :  { %s15_s13 = sshll.u32 %s720_s12, 4  ;;  %p673_p0 = scmp.ne.s32.totalorder %s863_s0, %s672_s16  ;;  %s16_s13 = int_to_ptr.vmem [resolvable:$true] %s15_s13 }
   0x3   :  { %p676_p1 = scmp.lt.u32.totalorder %s672_s16, %s863_s0 }
   0x5   :  { %p678_p2 = pnand %p676_p1, %p673_p0 }
   0x7   :  { %681 = shalt.err (!%p678_p2)
}
   0x8   :  { %s682_s21 = scalar_lea.vmem %s16_s13, 1024  ;;  %p687_p4 = scmp.lt.s32.totalorder %s16_s13, %s16_s13 }
   0x9   :  { %p683_p3 = scmp.ne.s32.totalorder %s16_s13, %s682_s21  ;;  %p688_p5 = scmp.lt.s32.totalorder %s682_s21, %s682_s21 }
   0xb   :  { %p689_p6 = por %p688_p5, %p687_p4 }
   0xd   :  { %p690_p7 = pnand %p689_p6, %p683_p3 }
   0xf   :  { %693 = shalt.err (!%p690_p7)
}
  0x10   :  { %s721_s22 = smov 256   ;;  %s722_s23 = smov 16  }
  0x11   :  { %21 = dma.hbm_to_vmem [thread:$0]  %s863_s0, 1024, %s16_s13, [#allocation3], %s721_s22, %s721_s22, %s722_s23  }
  0x12   :  { %s723_s26 = smov [#allocation4]   ;;  %s694_s30 = scalar_lea.hbm %s864_s1, 1024 }
  0x13   :  { %s27_s27 = sshll.u32 %s723_s26, 4  ;;  %p695_p8 = scmp.ne.s32.totalorder %s864_s1, %s694_s30  ;;  %s28_s27 = int_to_ptr.vmem [resolvable:$true] %s27_s27 }
  0x14   :  { %p698_p9 = scmp.lt.u32.totalorder %s694_s30, %s864_s1 }
  0x16   :  { %p700_p10 = pnand %p698_p9, %p695_p8 }
  0x18   :  { %703 = shalt.err (!%p700_p10)
}
  0x19   :  { %s704_s8 = scalar_lea.vmem %s28_s27, 1024  ;;  %p709_p12 = scmp.lt.s32.totalorder %s28_s27, %s28_s27 }
  0x1a   :  { %p705_p11 = scmp.ne.s32.totalorder %s28_s27, %s704_s8  ;;  %p710_p13 = scmp.lt.s32.totalorder %s704_s8, %s704_s8 }
  0x1c   :  { %p711_p0 = por %p710_p13, %p709_p12 }
  0x1e   :  { %p712_p1 = pnand %p711_p0, %p705_p11 }
  0x20   :  { %715 = shalt.err (!%p712_p1)
}
  0x21   :  { %33 = dma.hbm_to_vmem [thread:$0]  %s864_s1, 1024, %s28_s27, [#allocation5], %s721_s22, %s721_s22, %s722_s23  }
  0x22   :  { %716 = dma.done.wait [#allocation3], 1024  }
  0x23   :  { %717 = vsyncadd [#allocation3], 4294966272 }
  0x24   :  { %718 = dma.done.wait [#allocation5], 1024  }
  0x25   :  { %719 = vsyncadd [#allocation5], 4294966272  ;;  %v93_v0 = vlaneseq  ;;  %v46_v5 = vld [vmem:[#allocation2 + $0x20] sm:$0xff]  ;;  %v47_v6 = vld [vmem:[#allocation2 + $0x28] sm:$0xff]  ;;  %v724_v49 = vmov 0   ;;  %vm170_vm0 = vcmask 130112  }
  0x26   :  { %v54_v7 = vld [vmem:[#allocation4 + $0x20] sm:$0xff]  ;;  %v55_v9 = vld [vmem:[#allocation4 + $0x28] sm:$0xff]  ;;  %v48_v16 = vld [vmem:[#allocation2 + $0x30] sm:$0xff]  ;;  %670 = vset.pattern.permute.xlu0 %v724_v49  ;;  %671 = vset.pattern.permute.xlu1 %v724_v49  ;;  %vm181_vm1 = vcmask 1041409   ;;  %vm183_vm2 = vcmask 123904  }
  0x27   :  { %v94_v1 = vshrl.u32 %v93_v0, 7  ;;  %v128_v2 = vand.u32 127, %v93_v0  ;;  %v62_v10 = vsub.f32 %v46_v5, %v54_v7  ;;  %v42_v11 = vld [vmem:[#allocation2] sm:$0xff]  ;;  %v43_v12 = vld [vmem:[#allocation2 + $0x8] sm:$0xff]  ;;  %v63_v13 = vsub.f32 %v47_v6, %v55_v9  ;;  %v49_v20 = vld [vmem:[#allocation2 + $0x38] sm:$0xff] }
  0x28   :  { %v50_v14 = vld [vmem:[#allocation4] sm:$0xff]  ;;  %v51_v15 = vld [vmem:[#allocation4 + $0x8] sm:$0xff]  ;;  %v56_v21 = vld [vmem:[#allocation4 + $0x30] sm:$0xff] }
  0x29   :  { %v769_v3 = vsub.s32 %v128_v2, %v94_v1  ;;  %v165_v4 = vadd.s32 4294967288, %v128_v2  ;;  %v70_v17 = vmul.f32 %v62_v10, %v62_v10  ;;  %v58_v18 = vsub.f32 %v42_v11, %v50_v14  ;;  %v57_v22 = vld [vmem:[#allocation4 + $0x38] sm:$0xff]  ;;  %v44_v26 = vld [vmem:[#allocation2 + $0x10] sm:$0xff]  ;;  %v90_v42 = vld [vmem:[%s865_s2] sm:$0x3] }
  0x2a   :  { %v59_v19 = vsub.f32 %v43_v12, %v51_v15  ;;  %v71_v23 = vmul.f32 %v63_v13, %v63_v13  ;;  %v64_v24 = vsub.f32 %v48_v16, %v56_v21  ;;  %v65_v25 = vsub.f32 %v49_v20, %v57_v22  ;;  %v45_v27 = vld [vmem:[#allocation2 + $0x18] sm:$0xff]  ;;  %v52_v28 = vld [vmem:[#allocation4 + $0x10] sm:$0xff] }
  0x2b   :  { %v771_v8 = vsub.s32 %v165_v4, %v94_v1  ;;  %v66_v29 = vmul.f32 %v58_v18, %v58_v18  ;;  %v53_v31 = vld [vmem:[#allocation4 + $0x18] sm:$0xff]  ;;  %v60_v32 = vsub.f32 %v44_v26, %v52_v28  ;;  %v91_v43 = vmul.f32 %v90_v42, %v90_v42 }
  0x2c   :  { %v67_v30 = vmul.f32 %v59_v19, %v59_v19  ;;  %v80_v33 = vadd.f32 %v71_v23, %v70_v17  ;;  %v72_v34 = vmul.f32 %v64_v24, %v64_v24  ;;  %v73_v35 = vmul.f32 %v65_v25, %v65_v25 }
  0x2d   :  { %v61_v36 = vsub.f32 %v45_v27, %v53_v31  ;;  %v68_v38 = vmul.f32 %v60_v32, %v60_v32  ;;  %v776_v44 = vsub.s32 0, %v94_v1  ;;  %v779_v46 = vsub.s32 1, %v94_v1 }
  0x2e   :  { %v74_v37 = vadd.f32 %v67_v30, %v66_v29  ;;  %81 = vadd.xlane.f32.xlu1 %v80_v33  ;;  %v83_v39 = vadd.f32 %v73_v35, %v72_v34  ;;  %v137_v48 = vsub.s32 15, %v128_v2 }
  0x2f   :  { %v69_v40 = vmul.f32 %v61_v36, %v61_v36  ;;  %v96_v45 = vrot.slane %v91_v43, %v776_v44  ;;  %v107_v47 = vrot.slane %v91_v43, %v779_v46 }
  0x30   :  { %75 = vadd.xlane.f32.xlu0 %v74_v37 }
  0x31   :  { %v77_v41 = vadd.f32 %v69_v40, %v68_v38 }
  0x32   :  { %84 = vadd.xlane.f32.xlu1 %v83_v39 }
  0x34   :  { %78 = vadd.xlane.f32.xlu0 %v77_v41 }
  0x43   :  { %102 = vbcast.lane.b32.xlu1 %v96_v45, 264 }
  0x47   :  { %109 = vbcast.lane.b32.xlu1 %v107_v47, 256 }
  0x4a   :  { %98 = vbcast.lane.b32.xlu0 %v96_v45, 256 }
  0x4b   :  { %113 = vbcast.lane.b32.xlu1 %v107_v47, 264 }
  0x4e   :  { %139 = vbcast.lane.b32.xlu0 %v137_v48, 256 }
  0x4f   :  { %143 = vbcast.lane.b32.xlu1 %v137_v48, 264 }
  0xbb   :  { %v82_v50 = vpop.xlane.xlu1 %81 }
  0xbd   :  { %v76_v51 = vpop.xlane.xlu0 %75 }
  0xbf   :  { %v85_v52 = vpop.xlane.xlu1 %84 }
  0xc1   :  { %v79_v53 = vpop.xlane.xlu0 %78 }
  0xc3   :  { %v103_v54 = vpop.permute.xlu1 %102 }
  0xc4   :  { %v120_v57 = vmul.f32 %v103_v54, %v79_v53 }
  0xc5   :  { %v99_v55 = vpop.permute.xlu0 %98 }
  0xc6   :  { %v119_v56 = vmul.f32 %v99_v55, %v76_v51  ;;  %v124_v63 = vmul.f32 0.001953125, %v120_v57 }
  0xc7   :  { %v110_v59 = vpop.permute.xlu1 %109 }
  0xc8   :  { %v123_v58 = vmul.f32 0.001953125, %v119_v56  ;;  %v121_v60 = vmul.f32 %v110_v59, %v82_v50  ;;  %v134_v5 = vand.u32 4294967280, %v124_v63 }
  0xc9   :  { %v140_v61 = vpop.permute.xlu0 %139 }
  0xca   :  { %v133_v62 = vand.u32 4294967280, %v123_v58  ;;  %v125_v2 = vmul.f32 0.001953125, %v121_v60 }
  0xcb   :  { %v114_v1 = vpop.permute.xlu1 %113 }
  0xcc   :  { %v145_v0 = vor.u32 %v140_v61, %v133_v62  ;;  %v122_v4 = vmul.f32 %v114_v1, %v85_v52  ;;  %v135_v9 = vand.u32 4294967280, %v125_v2 }
  0xce   :  { %150 = vperm.xlu0 %670, %v145_v0   ;;  %v126_v6 = vmul.f32 0.001953125, %v122_v4  ;;  %v147_v13 = vor.u32 %v140_v61, %v135_v9 }
  0xcf   :  { %v144_v7 = vpop.permute.xlu1 %143 }
  0xd0   :  { %v136_v10 = vand.u32 4294967280, %v126_v6  ;;  %v146_v11 = vor.u32 %v144_v7, %v134_v5 }
  0xd2   :  { %v148_v12 = vor.u32 %v144_v7, %v136_v10  ;;  %153 = vperm.xlu1 %671, %v146_v11  }
  0xd4   :  { %159 = vperm.xlu0 %670, %v148_v12  }
  0xd6   :  { %156 = vperm.xlu1 %671, %v147_v13  }
 0x14d   :  { %v151_v14 = vpop.permute.xlu0 %150 }
 0x14e   :  { %v164_v19 = vrot.slane %v151_v14, %v769_v3 }
 0x151   :  { %v154_v15 = vpop.permute.xlu1 %153 }
 0x152   :  { %v169_v17 = vrot.slane %v154_v15, %v771_v8 }
 0x153   :  { %v160_v16 = vpop.permute.xlu0 %159 }
 0x154   :  { %v179_v20 = vrot.slane %v160_v16, %v771_v8  ;;  %v171_v22 = vsel %vm170_vm0, %v169_v17, %v164_v19 }
 0x155   :  { %v157_v18 = vpop.permute.xlu1 %156 }
 0x156   :  { %v175_v21 = vrot.slane %v157_v18, %v769_v3 }
 0x158   :  { %v180_v23 = vsel %vm170_vm0, %v179_v20, %v175_v21 }
 0x159   :  { %v182_v24 = vsel %vm181_vm1, %v180_v23, %v171_v22 }
 0x15a   :  { %v184_v25 = vsel %vm183_vm2, %v182_v24, 2147483648 }
 0x15b   :  { %v186_v26 = vshra.s32 %v184_v25, 16  ;;  %v185_v28 = vand.u32 65535, %v184_v25 }
 0x15d   :  { %v188_v27 = vcvt.s32.f32 %v186_v26  ;;  %v187_v30 = vcvt.s32.f32 %v185_v28 }
 0x15f   :  { %189 = vmax.xlane.f32.xlu1 %v188_v27 }
 0x1ec   :  { %v190_v29 = vpop.xlane.xlu1 %189 }
 0x1ed   :  { %vm191_vm3 = vcmp.eq.f32.partialorder %v188_v27, %v190_v29  ;;  %v196_v32 = vcvt.f32.s32 %v190_v29 }
 0x1ee   :  { %v192_v31 = vsel %vm191_vm3, %v187_v30, -inf }
 0x1ef   :  { %193 = vmax.xlane.f32.xlu0 %v192_v31  ;;  %v197_v34 = vshll.u32 %v196_v32, 16 }
 0x27c   :  { %v194_v33 = vpop.xlane.xlu0 %193 }
 0x27d   :  { %v195_v35 = vcvt.f32.s32 %v194_v33 }
 0x27f   :  { %v198_v36 = vadd.s32 %v197_v34, %v195_v35 }
 0x281   :  { %v205_v37 = vrot.slane %v198_v36, %v776_v44  ;;  %v209_v38 = vrot.slane %v198_v36, %v779_v46  ;;  %v199_v5 = vand.u32 4294967280, %v198_v36 }
 0x283   :  { %vm211_vm4 = vcmp.eq.s32.totalorder %v146_v11, %v205_v37  ;;  %vm210_vm5 = vcmp.eq.s32.totalorder %v145_v0, %v205_v37  ;;  %vm212_vm6 = vcmp.eq.s32.totalorder %v147_v13, %v209_v38  ;;  %vm213_vm7 = vcmp.eq.s32.totalorder %v148_v12, %v209_v38 }
 0x284   :  { %v215_v39 = vsel %vm211_vm4, 4294967295, %v146_v11  ;;  %v214_v40 = vsel %vm210_vm5, 4294967295, %v145_v0  ;;  %v216_v41 = vsel %vm212_vm6, 4294967295, %v147_v13  ;;  %v217_v42 = vsel %vm213_vm7, 4294967295, %v148_v12 }
 0x285   :  { %222 = vperm.xlu1 %671, %v215_v39   ;;  %219 = vperm.xlu0 %670, %v214_v40  }
 0x289   :  { %225 = vperm.xlu1 %671, %v216_v41   ;;  %228 = vperm.xlu0 %670, %v217_v42  }
 0x304   :  { %v223_v43 = vpop.permute.xlu1 %222  ;;  %v220_v45 = vpop.permute.xlu0 %219 }
 0x305   :  { %v237_v47 = vrot.slane %v223_v43, %v771_v8  ;;  %v233_v48 = vrot.slane %v220_v45, %v769_v3 }
 0x307   :  { %v238_v53 = vsel %vm170_vm0, %v237_v47, %v233_v48 }
 0x308   :  { %v226_v49 = vpop.permute.xlu1 %225  ;;  %v229_v50 = vpop.permute.xlu0 %228 }
 0x309   :  { %v242_v51 = vrot.slane %v226_v49, %v769_v3  ;;  %v246_v52 = vrot.slane %v229_v50, %v771_v8 }
 0x30b   :  { %v247_v54 = vsel %vm170_vm0, %v246_v52, %v242_v51 }
 0x30c   :  { %v248_v55 = vsel %vm181_vm1, %v247_v54, %v238_v53 }
 0x30d   :  { %v249_v56 = vsel %vm183_vm2, %v248_v55, 2147483648 }
 0x30e   :  { %v251_v57 = vshra.s32 %v249_v56, 16  ;;  %v250_v59 = vand.u32 65535, %v249_v56 }
 0x310   :  { %v253_v58 = vcvt.s32.f32 %v251_v57  ;;  %v252_v61 = vcvt.s32.f32 %v250_v59 }
 0x312   :  { %254 = vmax.xlane.f32.xlu1 %v253_v58 }
 0x39f   :  { %v255_v60 = vpop.xlane.xlu1 %254 }
 0x3a0   :  { %vm256_vm8 = vcmp.eq.f32.partialorder %v253_v58, %v255_v60  ;;  %v261_v63 = vcvt.f32.s32 %v255_v60 }
 0x3a1   :  { %v257_v62 = vsel %vm256_vm8, %v252_v61, -inf }
 0x3a2   :  { %258 = vmax.xlane.f32.xlu0 %v257_v62  ;;  %v262_v1 = vshll.u32 %v261_v63, 16 }
 0x42f   :  { %v259_v0 = vpop.xlane.xlu0 %258 }
 0x430   :  { %v260_v2 = vcvt.f32.s32 %v259_v0 }
 0x432   :  { %v263_v4 = vadd.s32 %v262_v1, %v260_v2 }
 0x434   :  { %v264_v6 = vand.u32 4294967280, %v263_v4  ;;  %v270_v7 = vrot.slane %v263_v4, %v776_v44  ;;  %v274_v9 = vrot.slane %v263_v4, %v779_v46 }
 0x436   :  { %v266_v10 = vadd.f32 %v264_v6, %v199_v5  ;;  %vm276_vm9 = vcmp.eq.s32.totalorder %v215_v39, %v270_v7  ;;  %vm275_vm10 = vcmp.eq.s32.totalorder %v214_v40, %v270_v7  ;;  %vm277_vm11 = vcmp.eq.s32.totalorder %v216_v41, %v274_v9 }
 0x437   :  { %v280_v11 = vsel %vm276_vm9, 4294967295, %v215_v39  ;;  %v279_v12 = vsel %vm275_vm10, 4294967295, %v214_v40  ;;  %vm278_vm12 = vcmp.eq.s32.totalorder %v217_v42, %v274_v9  ;;  %v281_v13 = vsel %vm277_vm11, 4294967295, %v216_v41 }
 0x438   :  { %287 = vperm.xlu1 %671, %v280_v11   ;;  %284 = vperm.xlu0 %670, %v279_v12   ;;  %v282_v14 = vsel %vm278_vm12, 4294967295, %v217_v42 }
 0x43c   :  { %290 = vperm.xlu1 %671, %v281_v13   ;;  %293 = vperm.xlu0 %670, %v282_v14  }
 0x4b7   :  { %v288_v15 = vpop.permute.xlu1 %287  ;;  %v285_v16 = vpop.permute.xlu0 %284 }
 0x4b8   :  { %v302_v17 = vrot.slane %v288_v15, %v771_v8  ;;  %v298_v18 = vrot.slane %v285_v16, %v769_v3 }
 0x4ba   :  { %v303_v23 = vsel %vm170_vm0, %v302_v17, %v298_v18 }
 0x4bb   :  { %v291_v19 = vpop.permute.xlu1 %290  ;;  %v294_v20 = vpop.permute.xlu0 %293 }
 0x4bc   :  { %v307_v21 = vrot.slane %v291_v19, %v769_v3  ;;  %v311_v22 = vrot.slane %v294_v20, %v771_v8 }
 0x4be   :  { %v312_v24 = vsel %vm170_vm0, %v311_v22, %v307_v21 }
 0x4bf   :  { %v313_v25 = vsel %vm181_vm1, %v312_v24, %v303_v23 }
 0x4c0   :  { %v314_v26 = vsel %vm183_vm2, %v313_v25, 2147483648 }
 0x4c1   :  { %v316_v27 = vshra.s32 %v314_v26, 16  ;;  %v315_v29 = vand.u32 65535, %v314_v26 }
 0x4c3   :  { %v318_v28 = vcvt.s32.f32 %v316_v27  ;;  %v317_v31 = vcvt.s32.f32 %v315_v29 }
 0x4c5   :  { %319 = vmax.xlane.f32.xlu1 %v318_v28 }
 0x552   :  { %v320_v30 = vpop.xlane.xlu1 %319 }
 0x553   :  { %vm321_vm13 = vcmp.eq.f32.partialorder %v318_v28, %v320_v30  ;;  %v326_v33 = vcvt.f32.s32 %v320_v30 }
 0x554   :  { %v322_v32 = vsel %vm321_vm13, %v317_v31, -inf }
 0x555   :  { %323 = vmax.xlane.f32.xlu0 %v322_v32  ;;  %v327_v35 = vshll.u32 %v326_v33, 16 }
 0x5e2   :  { %v324_v34 = vpop.xlane.xlu0 %323 }
 0x5e3   :  { %v325_v36 = vcvt.f32.s32 %v324_v34 }
 0x5e5   :  { %v328_v37 = vadd.s32 %v327_v35, %v325_v36 }
 0x5e7   :  { %v329_v38 = vand.u32 4294967280, %v328_v37  ;;  %v335_v39 = vrot.slane %v328_v37, %v776_v44  ;;  %v339_v40 = vrot.slane %v328_v37, %v779_v46 }
 0x5e9   :  { %v331_v41 = vadd.f32 %v329_v38, %v266_v10  ;;  %vm341_vm14 = vcmp.eq.s32.totalorder %v280_v11, %v335_v39  ;;  %vm340_vm15 = vcmp.eq.s32.totalorder %v279_v12, %v335_v39  ;;  %vm342_vm3 = vcmp.eq.s32.totalorder %v281_v13, %v339_v40 }
 0x5ea   :  { %v345_v42 = vsel %vm341_vm14, 4294967295, %v280_v11  ;;  %v344_v43 = vsel %vm340_vm15, 4294967295, %v279_v12  ;;  %vm343_vm4 = vcmp.eq.s32.totalorder %v282_v14, %v339_v40  ;;  %v346_v45 = vsel %vm342_vm3, 4294967295, %v281_v13 }
 0x5eb   :  { %352 = vperm.xlu1 %671, %v345_v42   ;;  %349 = vperm.xlu0 %670, %v344_v43   ;;  %v347_v47 = vsel %vm343_vm4, 4294967295, %v282_v14 }
 0x5ef   :  { %355 = vperm.xlu1 %671, %v346_v45   ;;  %358 = vperm.xlu0 %670, %v347_v47  }
 0x66a   :  { %v353_v48 = vpop.permute.xlu1 %352  ;;  %v350_v49 = vpop.permute.xlu0 %349 }
 0x66b   :  { %v367_v50 = vrot.slane %v353_v48, %v771_v8  ;;  %v363_v51 = vrot.slane %v350_v49, %v769_v3 }
 0x66d   :  { %v368_v56 = vsel %vm170_vm0, %v367_v50, %v363_v51 }
 0x66e   :  { %v356_v52 = vpop.permute.xlu1 %355  ;;  %v359_v53 = vpop.permute.xlu0 %358 }
 0x66f   :  { %v372_v54 = vrot.slane %v356_v52, %v769_v3  ;;  %v376_v55 = vrot.slane %v359_v53, %v771_v8 }
 0x671   :  { %v377_v57 = vsel %vm170_vm0, %v376_v55, %v372_v54 }
 0x672   :  { %v378_v58 = vsel %vm181_vm1, %v377_v57, %v368_v56 }
 0x673   :  { %v379_v59 = vsel %vm183_vm2, %v378_v58, 2147483648 }
 0x674   :  { %v381_v60 = vshra.s32 %v379_v59, 16  ;;  %v380_v62 = vand.u32 65535, %v379_v59 }
 0x676   :  { %v383_v61 = vcvt.s32.f32 %v381_v60  ;;  %v382_v0 = vcvt.s32.f32 %v380_v62 }
 0x678   :  { %384 = vmax.xlane.f32.xlu1 %v383_v61 }
 0x705   :  { %v385_v63 = vpop.xlane.xlu1 %384 }
 0x706   :  { %vm386_vm5 = vcmp.eq.f32.partialorder %v383_v61, %v385_v63  ;;  %v391_v2 = vcvt.f32.s32 %v385_v63 }
 0x707   :  { %v387_v1 = vsel %vm386_vm5, %v382_v0, -inf }
 0x708   :  { %388 = vmax.xlane.f32.xlu0 %v387_v1  ;;  %v392_v5 = vshll.u32 %v391_v2, 16 }
 0x795   :  { %v389_v4 = vpop.xlane.xlu0 %388 }
 0x796   :  { %v390_v6 = vcvt.f32.s32 %v389_v4 }
 0x798   :  { %v393_v7 = vadd.s32 %v392_v5, %v390_v6 }
 0x79a   :  { %v394_v9 = vand.u32 4294967280, %v393_v7  ;;  %v400_v10 = vrot.slane %v393_v7, %v776_v44  ;;  %v404_v11 = vrot.slane %v393_v7, %v779_v46 }
 0x79c   :  { %v396_v12 = vadd.f32 %v394_v9, %v331_v41  ;;  %vm406_vm6 = vcmp.eq.s32.totalorder %v345_v42, %v400_v10  ;;  %vm405_vm7 = vcmp.eq.s32.totalorder %v344_v43, %v400_v10  ;;  %vm407_vm8 = vcmp.eq.s32.totalorder %v346_v45, %v404_v11 }
 0x79d   :  { %v410_v13 = vsel %vm406_vm6, 4294967295, %v345_v42  ;;  %v409_v14 = vsel %vm405_vm7, 4294967295, %v344_v43  ;;  %vm408_vm9 = vcmp.eq.s32.totalorder %v347_v47, %v404_v11  ;;  %v411_v15 = vsel %vm407_vm8, 4294967295, %v346_v45 }
 0x79e   :  { %417 = vperm.xlu1 %671, %v410_v13   ;;  %414 = vperm.xlu0 %670, %v409_v14   ;;  %v412_v16 = vsel %vm408_vm9, 4294967295, %v347_v47 }
 0x7a2   :  { %420 = vperm.xlu1 %671, %v411_v15   ;;  %423 = vperm.xlu0 %670, %v412_v16  }
 0x81d   :  { %v418_v17 = vpop.permute.xlu1 %417  ;;  %v415_v18 = vpop.permute.xlu0 %414 }
 0x81e   :  { %v432_v19 = vrot.slane %v418_v17, %v771_v8  ;;  %v428_v20 = vrot.slane %v415_v18, %v769_v3 }
 0x820   :  { %v433_v25 = vsel %vm170_vm0, %v432_v19, %v428_v20 }
 0x821   :  { %v421_v21 = vpop.permute.xlu1 %420  ;;  %v424_v22 = vpop.permute.xlu0 %423 }
 0x822   :  { %v437_v23 = vrot.slane %v421_v21, %v769_v3  ;;  %v441_v24 = vrot.slane %v424_v22, %v771_v8 }
 0x824   :  { %v442_v26 = vsel %vm170_vm0, %v441_v24, %v437_v23 }
 0x825   :  { %v443_v27 = vsel %vm181_vm1, %v442_v26, %v433_v25 }
 0x826   :  { %v444_v28 = vsel %vm183_vm2, %v443_v27, 2147483648 }
 0x827   :  { %v446_v29 = vshra.s32 %v444_v28, 16  ;;  %v445_v31 = vand.u32 65535, %v444_v28 }
 0x829   :  { %v448_v30 = vcvt.s32.f32 %v446_v29  ;;  %v447_v33 = vcvt.s32.f32 %v445_v31 }
 0x82b   :  { %449 = vmax.xlane.f32.xlu1 %v448_v30 }
 0x8b8   :  { %v450_v32 = vpop.xlane.xlu1 %449 }
 0x8b9   :  { %vm451_vm10 = vcmp.eq.f32.partialorder %v448_v30, %v450_v32  ;;  %v456_v35 = vcvt.f32.s32 %v450_v32 }
 0x8ba   :  { %v452_v34 = vsel %vm451_vm10, %v447_v33, -inf }
 0x8bb   :  { %453 = vmax.xlane.f32.xlu0 %v452_v34  ;;  %v457_v37 = vshll.u32 %v456_v35, 16 }
 0x948   :  { %v454_v36 = vpop.xlane.xlu0 %453 }
 0x949   :  { %v455_v38 = vcvt.f32.s32 %v454_v36 }
 0x94b   :  { %v458_v39 = vadd.s32 %v457_v37, %v455_v38 }
 0x94d   :  { %v459_v40 = vand.u32 4294967280, %v458_v39  ;;  %v465_v41 = vrot.slane %v458_v39, %v776_v44  ;;  %v469_v42 = vrot.slane %v458_v39, %v779_v46 }
 0x94f   :  { %v461_v43 = vadd.f32 %v459_v40, %v396_v12  ;;  %vm471_vm11 = vcmp.eq.s32.totalorder %v410_v13, %v465_v41  ;;  %vm470_vm12 = vcmp.eq.s32.totalorder %v409_v14, %v465_v41  ;;  %vm472_vm13 = vcmp.eq.s32.totalorder %v411_v15, %v469_v42 }
 0x950   :  { %v475_v45 = vsel %vm471_vm11, 4294967295, %v410_v13  ;;  %v474_v47 = vsel %vm470_vm12, 4294967295, %v409_v14  ;;  %vm473_vm14 = vcmp.eq.s32.totalorder %v412_v16, %v469_v42  ;;  %v476_v48 = vsel %vm472_vm13, 4294967295, %v411_v15 }
 0x951   :  { %482 = vperm.xlu1 %671, %v475_v45   ;;  %479 = vperm.xlu0 %670, %v474_v47   ;;  %v477_v49 = vsel %vm473_vm14, 4294967295, %v412_v16 }
 0x955   :  { %485 = vperm.xlu1 %671, %v476_v48   ;;  %488 = vperm.xlu0 %670, %v477_v49  }
 0x9d0   :  { %v483_v50 = vpop.permute.xlu1 %482  ;;  %v480_v51 = vpop.permute.xlu0 %479 }
 0x9d1   :  { %v497_v52 = vrot.slane %v483_v50, %v771_v8  ;;  %v493_v53 = vrot.slane %v480_v51, %v769_v3 }
 0x9d3   :  { %v498_v58 = vsel %vm170_vm0, %v497_v52, %v493_v53 }
 0x9d4   :  { %v486_v54 = vpop.permute.xlu1 %485  ;;  %v489_v55 = vpop.permute.xlu0 %488 }
 0x9d5   :  { %v502_v56 = vrot.slane %v486_v54, %v769_v3  ;;  %v506_v57 = vrot.slane %v489_v55, %v771_v8 }
 0x9d7   :  { %v507_v59 = vsel %vm170_vm0, %v506_v57, %v502_v56 }
 0x9d8   :  { %v508_v60 = vsel %vm181_vm1, %v507_v59, %v498_v58 }
 0x9d9   :  { %v509_v61 = vsel %vm183_vm2, %v508_v60, 2147483648 }
 0x9da   :  { %v511_v62 = vshra.s32 %v509_v61, 16  ;;  %v510_v0 = vand.u32 65535, %v509_v61 }
 0x9dc   :  { %v513_v63 = vcvt.s32.f32 %v511_v62  ;;  %v512_v2 = vcvt.s32.f32 %v510_v0 }
 0x9de   :  { %514 = vmax.xlane.f32.xlu1 %v513_v63 }
 0xa6b   :  { %v515_v1 = vpop.xlane.xlu1 %514 }
 0xa6c   :  { %vm516_vm15 = vcmp.eq.f32.partialorder %v513_v63, %v515_v1  ;;  %v521_v5 = vcvt.f32.s32 %v515_v1 }
 0xa6d   :  { %v517_v4 = vsel %vm516_vm15, %v512_v2, -inf }
 0xa6e   :  { %518 = vmax.xlane.f32.xlu0 %v517_v4  ;;  %v522_v7 = vshll.u32 %v521_v5, 16 }
 0xafb   :  { %v519_v6 = vpop.xlane.xlu0 %518 }
 0xafc   :  { %v520_v9 = vcvt.f32.s32 %v519_v6 }
 0xafe   :  { %v523_v10 = vadd.s32 %v522_v7, %v520_v9 }
 0xb00   :  { %v524_v11 = vand.u32 4294967280, %v523_v10  ;;  %v530_v12 = vrot.slane %v523_v10, %v776_v44  ;;  %v534_v13 = vrot.slane %v523_v10, %v779_v46 }
 0xb02   :  { %vm536_vm3 = vcmp.eq.s32.totalorder %v475_v45, %v530_v12  ;;  %vm535_vm4 = vcmp.eq.s32.totalorder %v474_v47, %v530_v12  ;;  %vm537_vm5 = vcmp.eq.s32.totalorder %v476_v48, %v534_v13  ;;  %vm538_vm6 = vcmp.eq.s32.totalorder %v477_v49, %v534_v13 }
 0xb03   :  { %v540_v14 = vsel %vm536_vm3, 4294967295, %v475_v45  ;;  %v539_v15 = vsel %vm535_vm4, 4294967295, %v474_v47  ;;  %v526_v16 = vadd.f32 %v524_v11, %v461_v43  ;;  %v541_v17 = vsel %vm537_vm5, 4294967295, %v476_v48 }
 0xb04   :  { %547 = vperm.xlu1 %671, %v540_v14   ;;  %544 = vperm.xlu0 %670, %v539_v15   ;;  %v542_v18 = vsel %vm538_vm6, 4294967295, %v477_v49 }
 0xb08   :  { %550 = vperm.xlu1 %671, %v541_v17   ;;  %553 = vperm.xlu0 %670, %v542_v18  }
 0xb83   :  { %v548_v19 = vpop.permute.xlu1 %547  ;;  %v545_v20 = vpop.permute.xlu0 %544 }
 0xb84   :  { %v562_v21 = vrot.slane %v548_v19, %v771_v8  ;;  %v558_v22 = vrot.slane %v545_v20, %v769_v3 }
 0xb86   :  { %v563_v27 = vsel %vm170_vm0, %v562_v21, %v558_v22 }
 0xb87   :  { %v551_v23 = vpop.permute.xlu1 %550  ;;  %v554_v24 = vpop.permute.xlu0 %553 }
 0xb88   :  { %v567_v25 = vrot.slane %v551_v23, %v769_v3  ;;  %v571_v26 = vrot.slane %v554_v24, %v771_v8 }
 0xb8a   :  { %v572_v28 = vsel %vm170_vm0, %v571_v26, %v567_v25 }
 0xb8b   :  { %v573_v29 = vsel %vm181_vm1, %v572_v28, %v563_v27 }
 0xb8c   :  { %v574_v30 = vsel %vm183_vm2, %v573_v29, 2147483648 }
 0xb8d   :  { %v576_v31 = vshra.s32 %v574_v30, 16  ;;  %v575_v33 = vand.u32 65535, %v574_v30 }
 0xb8f   :  { %v578_v32 = vcvt.s32.f32 %v576_v31  ;;  %v577_v35 = vcvt.s32.f32 %v575_v33 }
 0xb91   :  { %579 = vmax.xlane.f32.xlu1 %v578_v32 }
 0xc1e   :  { %v580_v34 = vpop.xlane.xlu1 %579 }
 0xc1f   :  { %vm581_vm7 = vcmp.eq.f32.partialorder %v578_v32, %v580_v34  ;;  %v586_v37 = vcvt.f32.s32 %v580_v34 }
 0xc20   :  { %v582_v36 = vsel %vm581_vm7, %v577_v35, -inf }
 0xc21   :  { %583 = vmax.xlane.f32.xlu0 %v582_v36  ;;  %v587_v39 = vshll.u32 %v586_v37, 16 }
 0xcae   :  { %v584_v38 = vpop.xlane.xlu0 %583 }
 0xcaf   :  { %v585_v40 = vcvt.f32.s32 %v584_v38 }
 0xcb1   :  { %v588_v41 = vadd.s32 %v587_v39, %v585_v40 }
 0xcb3   :  { %v589_v42 = vand.u32 4294967280, %v588_v41  ;;  %v595_v43 = vrot.slane %v588_v41, %v776_v44  ;;  %v599_v45 = vrot.slane %v588_v41, %v779_v46 }
 0xcb5   :  { %vm601_vm8 = vcmp.eq.s32.totalorder %v540_v14, %v595_v43  ;;  %vm600_vm9 = vcmp.eq.s32.totalorder %v539_v15, %v595_v43  ;;  %vm602_vm10 = vcmp.eq.s32.totalorder %v541_v17, %v599_v45  ;;  %vm603_vm11 = vcmp.eq.s32.totalorder %v542_v18, %v599_v45 }
 0xcb6   :  { %v605_v47 = vsel %vm601_vm8, 4294967295, %v540_v14  ;;  %v604_v48 = vsel %vm600_vm9, 4294967295, %v539_v15  ;;  %v591_v49 = vadd.f32 %v589_v42, %v526_v16  ;;  %v606_v50 = vsel %vm602_vm10, 4294967295, %v541_v17 }
 0xcb7   :  { %612 = vperm.xlu1 %671, %v605_v47   ;;  %609 = vperm.xlu0 %670, %v604_v48   ;;  %v607_v51 = vsel %vm603_vm11, 4294967295, %v542_v18 }
 0xcbb   :  { %615 = vperm.xlu1 %671, %v606_v50   ;;  %618 = vperm.xlu0 %670, %v607_v51  }
 0xd36   :  { %v613_v52 = vpop.permute.xlu1 %612  ;;  %v610_v53 = vpop.permute.xlu0 %609 }
 0xd37   :  { %v627_v54 = vrot.slane %v613_v52, %v771_v8  ;;  %v623_v44 = vrot.slane %v610_v53, %v769_v3 }
 0xd39   :  { %v628_v58 = vsel %vm170_vm0, %v627_v54, %v623_v44 }
 0xd3a   :  { %v616_v46 = vpop.permute.xlu1 %615  ;;  %v619_v55 = vpop.permute.xlu0 %618 }
 0xd3b   :  { %v632_v56 = vrot.slane %v616_v46, %v769_v3  ;;  %v636_v57 = vrot.slane %v619_v55, %v771_v8 }
 0xd3d   :  { %v637_v59 = vsel %vm170_vm0, %v636_v57, %v632_v56  ;;  %vm657_vm0 = vcmask 1024  }
 0xd3e   :  { %v638_v60 = vsel %vm181_vm1, %v637_v59, %v628_v58 }
 0xd3f   :  { %v639_v61 = vsel %vm183_vm2, %v638_v60, 2147483648 }
 0xd40   :  { %v641_v62 = vshra.s32 %v639_v61, 16  ;;  %v640_v0 = vand.u32 65535, %v639_v61 }
 0xd42   :  { %v643_v63 = vcvt.s32.f32 %v641_v62  ;;  %v642_v2 = vcvt.s32.f32 %v640_v0 }
 0xd44   :  { %644 = vmax.xlane.f32.xlu1 %v643_v63 }
 0xdd1   :  { %v645_v1 = vpop.xlane.xlu1 %644 }
 0xdd2   :  { %vm646_vm12 = vcmp.eq.f32.partialorder %v643_v63, %v645_v1  ;;  %v651_v3 = vcvt.f32.s32 %v645_v1 }
 0xdd3   :  { %v647_v4 = vsel %vm646_vm12, %v642_v2, -inf }
 0xdd4   :  { %648 = vmax.xlane.f32.xlu0 %v647_v4  ;;  %v652_v8 = vshll.u32 %v651_v3, 16 }
 0xe61   :  { %v649_v5 = vpop.xlane.xlu0 %648 }
 0xe62   :  { %v650_v6 = vcvt.f32.s32 %v649_v5 }
 0xe64   :  { %v653_v7 = vadd.s32 %v652_v8, %v650_v6 }
 0xe66   :  { %v654_v9 = vand.u32 4294967280, %v653_v7 }
 0xe68   :  { %v656_v10 = vadd.f32 %v654_v9, %v591_v49 }
 0xe6a   :  { %658 = vst.msk [vmem:[%s866_s3] sm:$0x3] %vm657_vm0, %v656_v10 }
 0xe6b   :  { %663 = vsyncpa [#allocation3], 1 }
 0xe6c   :  { %664 = vsyncpa [#allocation5], 1 }

</bundles_post_ra>
